<compile_context>
chip_gen: v5e
topology: v5e:2x2
jax: 0.10.0
libtpu: 0.0.40
codegen_flags: <defaults>
</compile_context>

<pallas_src>
import functools

import jax
import jax.numpy as jnp
from jax.experimental import pallas as pl
from jax.experimental.pallas import tpu as pltpu

LOG_PARA = 100.0   # cfg.LOG_PARA
KERNAL5 = 8        # build_loss: filter5 = ones(1,1,8,8), stride=8


def _crowd_kernel(w_ref, bias_ref, a_ref, b_ref, q_ref, p_ref, img_ref, gt_ref,
                  count_ref, loss_ref, *, channels, ho_first):
    """One batch element per grid step (batch axis is megacore-parallel)."""

    # ---- backbone stand-in: stride-8 8x8 conv (C->1) -----------------------------
    # Per-channel periodically-tiled weight rebuilt in-kernel from the raw (8,8)
    # kernel via the 0/1 selection matrices A (H,8) and B (8,W):  wtile_c = A w_c B.
    def tile_w(c):
        t = jnp.dot(a_ref[...], w_ref[c], preferred_element_type=jnp.float32)
        return jnp.dot(t, b_ref[...], preferred_element_type=jnp.float32)

    weighted = img_ref[0, 0].astype(jnp.float32) * tile_w(0)
    for c in range(1, channels):                       # static unroll, small C
        weighted = weighted + img_ref[0, c].astype(jnp.float32) * tile_w(c)

    # 8x8 / stride-8 sum pooling as Q @ x @ P (cheaper association picked statically).
    def pool8(x):
        if ho_first:
            t = jnp.dot(q_ref[...], x, preferred_element_type=jnp.float32)
            return jnp.dot(t, p_ref[...], preferred_element_type=jnp.float32)
        t = jnp.dot(x, p_ref[...], preferred_element_type=jnp.float32)
        return jnp.dot(q_ref[...], t, preferred_element_type=jnp.float32)

    count = pool8(weighted) + bias_ref[...]            # (Ho, Wo), bias broadcast
    count_ref[0] = count.astype(count_ref.dtype)

    # ---- gt_map_5 = conv2d(gt / LOG_PARA, ones(8,8), stride=8) -------------------
    # Pooling is linear: scale after pooling (64x fewer multiplies, exact).
    gt5 = pool8(gt_ref[0].astype(jnp.float32)) * (1.0 / LOG_PARA)

    # ---- per-image L1 partial sum (mean taken outside the kernel) ----------------
    loss_ref[0] = jnp.sum(jnp.abs(count - gt5), keepdims=True)   # (1, 1)


def crowd_counter_forward(img, gt_map, weight, bias):
    """Returns (count_map, loss_total, loss_sum), mirroring CrowdCounter.forward."""
    N, C, H, W = img.shape
    Ho, Wo = H // KERNAL5, W // KERNAL5

    # Ship image / gt in bf16 (HBM-bandwidth + VMEM win); compute stays f32 in-kernel.
    img_bf16 = img.astype(jnp.bfloat16)
    gt_bf16 = gt_map.astype(jnp.bfloat16)

    # Raw conv weight (C, 8, 8) + tiny period-8 selection matrices (all 0/1, exact).
    wraw = weight.reshape(C, KERNAL5, KERNAL5).astype(jnp.float32)
    eye8 = jnp.eye(KERNAL5, dtype=jnp.float32)
    amat = jnp.tile(eye8, (Ho, 1))                                         # (H, 8)
    bmat = jnp.tile(eye8, (1, Wo))                                         # (8, W)
    qmat = jnp.kron(jnp.eye(Ho, dtype=jnp.float32),
                    jnp.ones((1, KERNAL5), jnp.float32))                   # (Ho, H)
    pmat = jnp.kron(jnp.eye(Wo, dtype=jnp.float32),
                    jnp.ones((KERNAL5, 1), jnp.float32))                   # (W, Wo)
    bias2 = bias.reshape(1, 1).astype(jnp.float32)

    kernel = functools.partial(_crowd_kernel, channels=C, ho_first=(Ho <= Wo))

    # --- VMEM budget: double-buffered per-step blocks + constants + body slack ----
    bytes_img_blk = C * H * W * 2                      # bf16
    bytes_gt_blk = H * W * 2                           # bf16
    bytes_out_blk = Ho * Wo * 4 + 4                    # count tile + loss partial
    bytes_consts = 4 * (C * KERNAL5 * KERNAL5 + 1 + H * KERNAL5 + KERNAL5 * W
                        + Ho * H + W * Wo)
    bytes_body = 4 * (3 * H * W + Ho * W + Ho * Wo)    # f32 intermediates
    needed = (2 * (bytes_img_blk + bytes_gt_blk + bytes_out_blk)
              + 2 * bytes_consts + bytes_body + (2 << 20))
    try:
        vmem_cap = int(pltpu.get_tpu_info().vmem_capacity_bytes)
    except Exception:
        vmem_cap = 64 * 1024 * 1024                    # conservative (v7x per-TC)
    vmem_limit = int(min(max(needed, 16 * 1024 * 1024), int(0.75 * vmem_cap)))

    count_map, loss_part = pl.pallas_call(
        kernel,
        out_shape=(jax.ShapeDtypeStruct((N, Ho, Wo), jnp.float32),
                   jax.ShapeDtypeStruct((N, 1, 1), jnp.float32)),
        grid_spec=pltpu.PrefetchScalarGridSpec(
            num_scalar_prefetch=0,
            grid=(N,),
            in_specs=[
                pl.BlockSpec((C, KERNAL5, KERNAL5), lambda n: (0, 0, 0)),  # raw weight
                pl.BlockSpec((1, 1), lambda n: (0, 0)),                    # bias
                pl.BlockSpec((H, KERNAL5), lambda n: (0, 0)),              # A (row tiling)
                pl.BlockSpec((KERNAL5, W), lambda n: (0, 0)),              # B (col tiling)
                pl.BlockSpec((Ho, H), lambda n: (0, 0)),                   # Q (row pooling)
                pl.BlockSpec((W, Wo), lambda n: (0, 0)),                   # P (col pooling)
                pl.BlockSpec((1, C, H, W), lambda n: (n, 0, 0, 0)),        # image (bf16)
                pl.BlockSpec((1, H, W), lambda n: (n, 0, 0)),              # gt map (bf16)
            ],
            out_specs=[
                pl.BlockSpec((1, Ho, Wo), lambda n: (n, 0, 0)),            # count map
                pl.BlockSpec((1, 1, 1), lambda n: (n, 0, 0)),              # per-image |.| sum
            ],
        ),
        compiler_params=pltpu.CompilerParams(
            dimension_semantics=("parallel",),
            vmem_limit_bytes=vmem_limit,
        ),
    )(wraw, bias2, amat, bmat, qmat, pmat, img_bf16, gt_bf16)

    count_map = count_map.reshape(N, 1, Ho, Wo)
    loss_total = jnp.sum(loss_part) / float(N * Ho * Wo)   # L1Loss mean reduction
    loss_sum = loss_total          # SumLoss=True -> loss_total == loss_sum_all
    return count_map, loss_total, loss_sum


def _reference(img, gt_map, weight, bias):
    """Plain-JAX (f32) reference of the same forward semantics."""
    N, C, H, W = img.shape
    Ho, Wo = H // KERNAL5, W // KERNAL5
    patches = img.reshape(N, C, Ho, KERNAL5, Wo, KERNAL5)
    patches = patches.transpose(0, 2, 4, 1, 3, 5).reshape(N, Ho, Wo, -1)
    count = patches @ weight.reshape(-1) + bias[0]
    count = count.reshape(N, 1, Ho, Wo)
    gt = gt_map[:, None, :, :] / LOG_PARA
    gt5 = gt.reshape(N, 1, Ho, KERNAL5, Wo, KERNAL5).sum(axis=(3, 5))
    loss = jnp.mean(jnp.abs(count - gt5))
    return count, loss


if __name__ == "__main__":
    key = jax.random.PRNGKey(0)
    k1, k2, k3, k4 = jax.random.split(key, 4)

    N, C, H, W = 2, 3, 32, 32
    img = jax.random.normal(k1, (N, C, H, W), jnp.float32)
    gt_map = jax.random.uniform(k2, (N, H, W), jnp.float32) * 10.0
    # deterministic synthetic backbone params: 8x8 stride-8 conv, C -> 1
    weight = jax.random.normal(k3, (1, C, KERNAL5, KERNAL5), jnp.float32) * 0.05
    bias = jax.random.normal(k4, (1,), jnp.float32) * 0.01

    count_map, loss_total, loss_sum = crowd_counter_forward(img, gt_map, weight, bias)
    jax.block_until_ready((count_map, loss_total, loss_sum))

    # Exact check against a reference fed the same bf16-quantized inputs the kernel
    # DMAs (isolates the kernel math from the deliberate bf16 input rounding).
    img_q = img.astype(jnp.bfloat16).astype(jnp.float32)
    gt_q = gt_map.astype(jnp.bfloat16).astype(jnp.float32)
    ref_count_q, ref_loss_q = _reference(img_q, gt_q, weight, bias)
    assert count_map.shape == (N, 1, H // KERNAL5, W // KERNAL5)
    assert jnp.allclose(count_map, ref_count_q, atol=1e-4, rtol=1e-4)
    assert jnp.allclose(loss_total, ref_loss_q, atol=1e-4, rtol=1e-4)
    assert jnp.allclose(loss_sum, ref_loss_q, atol=1e-4, rtol=1e-4)

    # Loose check against the pure-f32 reference (difference = bf16 input rounding only).
    ref_count, ref_loss = _reference(img, gt_map, weight, bias)
    assert jnp.allclose(count_map, ref_count, atol=5e-2, rtol=5e-2)
    assert jnp.allclose(loss_total, ref_loss, atol=5e-2, rtol=5e-2)

    print("KERNEL_OK")
</pallas_src>

<mosaic_0001>
module attributes {stable_mosaic.version = 11 : i64} {
  func.func @_crowd_kernel(%arg0: i32, %arg1: memref<3x8x8xf32, #tpu.memory_space<vmem>>, %arg2: memref<1x1xf32, #tpu.memory_space<vmem>>, %arg3: memref<32x8xf32, #tpu.memory_space<vmem>>, %arg4: memref<8x32xf32, #tpu.memory_space<vmem>>, %arg5: memref<4x32xf32, #tpu.memory_space<vmem>>, %arg6: memref<32x4xf32, #tpu.memory_space<vmem>>, %arg7: memref<1x3x32x32xbf16, #tpu.memory_space<vmem>>, %arg8: memref<1x32x32xbf16, #tpu.memory_space<vmem>>, %arg9: memref<1x4x4xf32, #tpu.memory_space<vmem>>, %arg10: memref<1x1x1xf32, #tpu.memory_space<vmem>>) attributes {dimension_semantics = [#tpu.dimension_semantics<parallel>], iteration_bounds = array<i64: 2>, scalar_prefetch = 0 : i64, scratch_operands = 0 : i64, tpu.core_type = #tpu.core_type<tc>, window_params = [{pipeline_mode = #tpu.pipeline_mode<synchronous>, transform_indices = @transform_0, window_bounds = array<i64: 3, 8, 8>}, {pipeline_mode = #tpu.pipeline_mode<synchronous>, transform_indices = @transform_1, window_bounds = array<i64: 1, 1>}, {pipeline_mode = #tpu.pipeline_mode<synchronous>, transform_indices = @transform_2, window_bounds = array<i64: 32, 8>}, {pipeline_mode = #tpu.pipeline_mode<synchronous>, transform_indices = @transform_3, window_bounds = array<i64: 8, 32>}, {pipeline_mode = #tpu.pipeline_mode<synchronous>, transform_indices = @transform_4, window_bounds = array<i64: 4, 32>}, {pipeline_mode = #tpu.pipeline_mode<synchronous>, transform_indices = @transform_5, window_bounds = array<i64: 32, 4>}, {transform_indices = @transform_6, window_bounds = array<i64: 1, 3, 32, 32>}, {transform_indices = @transform_7, window_bounds = array<i64: 1, 32, 32>}, {transform_indices = @transform_8, window_bounds = array<i64: 1, 4, 4>}, {transform_indices = @transform_9, window_bounds = array<i64: 1, 1, 1>}]} {
    %c0 = arith.constant 0 : index
    %c0_0 = arith.constant 0 : index
    %c0_1 = arith.constant 0 : index
    %c0_2 = arith.constant 0 : index
    %0 = vector.load %arg7[%c0, %c0_0, %c0_1, %c0_2] : memref<1x3x32x32xbf16, #tpu.memory_space<vmem>>, vector<1x1x32x32xbf16>
    %1 = vector.shape_cast %0 : vector<1x1x32x32xbf16> to vector<32x32xbf16>
    %2 = arith.extf %1 : vector<32x32xbf16> to vector<32x32xf32>
    %c0_3 = arith.constant 0 : index
    %c0_4 = arith.constant 0 : index
    %3 = vector.load %arg3[%c0_3, %c0_4] : memref<32x8xf32, #tpu.memory_space<vmem>>, vector<32x8xf32>
    %c0_5 = arith.constant 0 : index
    %c0_6 = arith.constant 0 : index
    %c0_7 = arith.constant 0 : index
    %4 = vector.load %arg1[%c0_5, %c0_6, %c0_7] : memref<3x8x8xf32, #tpu.memory_space<vmem>>, vector<1x8x8xf32>
    %5 = vector.shape_cast %4 : vector<1x8x8xf32> to vector<8x8xf32>
    %cst = arith.constant dense<0.000000e+00> : vector<32x8xf32>
    %6 = tpu.matmul %3, %5, %cst {dimension_numbers = #tpu.dot_dimension_numbers<[1], [0], [0], [1], [0, 0, 1, 1], [], []>} : vector<32x8xf32>, vector<8x8xf32>, vector<32x8xf32> -> vector<32x8xf32>
    %c0_8 = arith.constant 0 : index
    %c0_9 = arith.constant 0 : index
    %7 = vector.load %arg4[%c0_8, %c0_9] : memref<8x32xf32, #tpu.memory_space<vmem>>, vector<8x32xf32>
    %cst_10 = arith.constant dense<0.000000e+00> : vector<32x32xf32>
    %8 = tpu.matmul %6, %7, %cst_10 {dimension_numbers = #tpu.dot_dimension_numbers<[1], [0], [0], [1], [0, 0, 1, 1], [], []>} : vector<32x8xf32>, vector<8x32xf32>, vector<32x32xf32> -> vector<32x32xf32>
    %9 = arith.mulf %2, %8 : vector<32x32xf32>
    %c0_11 = arith.constant 0 : index
    %c1 = arith.constant 1 : index
    %c0_12 = arith.constant 0 : index
    %c0_13 = arith.constant 0 : index
    %10 = vector.load %arg7[%c0_11, %c1, %c0_12, %c0_13] : memref<1x3x32x32xbf16, #tpu.memory_space<vmem>>, vector<1x1x32x32xbf16>
    %11 = vector.shape_cast %10 : vector<1x1x32x32xbf16> to vector<32x32xbf16>
    %12 = arith.extf %11 : vector<32x32xbf16> to vector<32x32xf32>
    %c0_14 = arith.constant 0 : index
    %c0_15 = arith.constant 0 : index
    %13 = vector.load %arg3[%c0_14, %c0_15] : memref<32x8xf32, #tpu.memory_space<vmem>>, vector<32x8xf32>
    %c1_16 = arith.constant 1 : index
    %c0_17 = arith.constant 0 : index
    %c0_18 = arith.constant 0 : index
    %14 = vector.load %arg1[%c1_16, %c0_17, %c0_18] : memref<3x8x8xf32, #tpu.memory_space<vmem>>, vector<1x8x8xf32>
    %15 = vector.shape_cast %14 : vector<1x8x8xf32> to vector<8x8xf32>
    %cst_19 = arith.constant dense<0.000000e+00> : vector<32x8xf32>
    %16 = tpu.matmul %13, %15, %cst_19 {dimension_numbers = #tpu.dot_dimension_numbers<[1], [0], [0], [1], [0, 0, 1, 1], [], []>} : vector<32x8xf32>, vector<8x8xf32>, vector<32x8xf32> -> vector<32x8xf32>
    %c0_20 = arith.constant 0 : index
    %c0_21 = arith.constant 0 : index
    %17 = vector.load %arg4[%c0_20, %c0_21] : memref<8x32xf32, #tpu.memory_space<vmem>>, vector<8x32xf32>
    %cst_22 = arith.constant dense<0.000000e+00> : vector<32x32xf32>
    %18 = tpu.matmul %16, %17, %cst_22 {dimension_numbers = #tpu.dot_dimension_numbers<[1], [0], [0], [1], [0, 0, 1, 1], [], []>} : vector<32x8xf32>, vector<8x32xf32>, vector<32x32xf32> -> vector<32x32xf32>
    %19 = arith.mulf %12, %18 : vector<32x32xf32>
    %20 = arith.addf %9, %19 : vector<32x32xf32>
    %c0_23 = arith.constant 0 : index
    %c2 = arith.constant 2 : index
    %c0_24 = arith.constant 0 : index
    %c0_25 = arith.constant 0 : index
    %21 = vector.load %arg7[%c0_23, %c2, %c0_24, %c0_25] : memref<1x3x32x32xbf16, #tpu.memory_space<vmem>>, vector<1x1x32x32xbf16>
    %22 = vector.shape_cast %21 : vector<1x1x32x32xbf16> to vector<32x32xbf16>
    %23 = arith.extf %22 : vector<32x32xbf16> to vector<32x32xf32>
    %c0_26 = arith.constant 0 : index
    %c0_27 = arith.constant 0 : index
    %24 = vector.load %arg3[%c0_26, %c0_27] : memref<32x8xf32, #tpu.memory_space<vmem>>, vector<32x8xf32>
    %c2_28 = arith.constant 2 : index
    %c0_29 = arith.constant 0 : index
    %c0_30 = arith.constant 0 : index
    %25 = vector.load %arg1[%c2_28, %c0_29, %c0_30] : memref<3x8x8xf32, #tpu.memory_space<vmem>>, vector<1x8x8xf32>
    %26 = vector.shape_cast %25 : vector<1x8x8xf32> to vector<8x8xf32>
    %cst_31 = arith.constant dense<0.000000e+00> : vector<32x8xf32>
    %27 = tpu.matmul %24, %26, %cst_31 {dimension_numbers = #tpu.dot_dimension_numbers<[1], [0], [0], [1], [0, 0, 1, 1], [], []>} : vector<32x8xf32>, vector<8x8xf32>, vector<32x8xf32> -> vector<32x8xf32>
    %c0_32 = arith.constant 0 : index
    %c0_33 = arith.constant 0 : index
    %28 = vector.load %arg4[%c0_32, %c0_33] : memref<8x32xf32, #tpu.memory_space<vmem>>, vector<8x32xf32>
    %cst_34 = arith.constant dense<0.000000e+00> : vector<32x32xf32>
    %29 = tpu.matmul %27, %28, %cst_34 {dimension_numbers = #tpu.dot_dimension_numbers<[1], [0], [0], [1], [0, 0, 1, 1], [], []>} : vector<32x8xf32>, vector<8x32xf32>, vector<32x32xf32> -> vector<32x32xf32>
    %30 = arith.mulf %23, %29 : vector<32x32xf32>
    %31 = arith.addf %20, %30 : vector<32x32xf32>
    %c0_35 = arith.constant 0 : index
    %c0_36 = arith.constant 0 : index
    %32 = vector.load %arg5[%c0_35, %c0_36] : memref<4x32xf32, #tpu.memory_space<vmem>>, vector<4x32xf32>
    %cst_37 = arith.constant dense<0.000000e+00> : vector<4x32xf32>
    %33 = tpu.matmul %32, %31, %cst_37 {dimension_numbers = #tpu.dot_dimension_numbers<[1], [0], [0], [1], [0, 0, 1, 1], [], []>} : vector<4x32xf32>, vector<32x32xf32>, vector<4x32xf32> -> vector<4x32xf32>
    %c0_38 = arith.constant 0 : index
    %c0_39 = arith.constant 0 : index
    %34 = vector.load %arg6[%c0_38, %c0_39] : memref<32x4xf32, #tpu.memory_space<vmem>>, vector<32x4xf32>
    %cst_40 = arith.constant dense<0.000000e+00> : vector<4x4xf32>
    %35 = tpu.matmul %33, %34, %cst_40 {dimension_numbers = #tpu.dot_dimension_numbers<[1], [0], [0], [1], [0, 0, 1, 1], [], []>} : vector<4x32xf32>, vector<32x4xf32>, vector<4x4xf32> -> vector<4x4xf32>
    %c0_41 = arith.constant 0 : index
    %c0_42 = arith.constant 0 : index
    %36 = vector.load %arg2[%c0_41, %c0_42] : memref<1x1xf32, #tpu.memory_space<vmem>>, vector<1x1xf32>
    %37 = vector.broadcast %36 : vector<1x1xf32> to vector<4x4xf32>
    %38 = arith.addf %35, %37 : vector<4x4xf32>
    %c0_43 = arith.constant 0 : index
    %c0_44 = arith.constant 0 : index
    %c0_45 = arith.constant 0 : index
    %39 = vector.load %arg9[%c0_43, %c0_44, %c0_45] : memref<1x4x4xf32, #tpu.memory_space<vmem>>, vector<1x4x4xf32>
    %40 = vector.shape_cast %39 : vector<1x4x4xf32> to vector<4x4xf32>
    %41 = vector.shape_cast %38 : vector<4x4xf32> to vector<1x4x4xf32>
    tpu.vector_store %arg9[%c0_43, %c0_44, %c0_45], %41 {strides = array<i32>} : memref<1x4x4xf32, #tpu.memory_space<vmem>>, vector<1x4x4xf32>,
    %c0_46 = arith.constant 0 : index
    %c0_47 = arith.constant 0 : index
    %c0_48 = arith.constant 0 : index
    %42 = vector.load %arg8[%c0_46, %c0_47, %c0_48] : memref<1x32x32xbf16, #tpu.memory_space<vmem>>, vector<1x32x32xbf16>
    %43 = vector.shape_cast %42 : vector<1x32x32xbf16> to vector<32x32xbf16>
    %44 = arith.extf %43 : vector<32x32xbf16> to vector<32x32xf32>
    %c0_49 = arith.constant 0 : index
    %c0_50 = arith.constant 0 : index
    %45 = vector.load %arg5[%c0_49, %c0_50] : memref<4x32xf32, #tpu.memory_space<vmem>>, vector<4x32xf32>
    %cst_51 = arith.constant dense<0.000000e+00> : vector<4x32xf32>
    %46 = tpu.matmul %45, %44, %cst_51 {dimension_numbers = #tpu.dot_dimension_numbers<[1], [0], [0], [1], [0, 0, 1, 1], [], []>} : vector<4x32xf32>, vector<32x32xf32>, vector<4x32xf32> -> vector<4x32xf32>
    %c0_52 = arith.constant 0 : index
    %c0_53 = arith.constant 0 : index
    %47 = vector.load %arg6[%c0_52, %c0_53] : memref<32x4xf32, #tpu.memory_space<vmem>>, vector<32x4xf32>
    %cst_54 = arith.constant dense<0.000000e+00> : vector<4x4xf32>
    %48 = tpu.matmul %46, %47, %cst_54 {dimension_numbers = #tpu.dot_dimension_numbers<[1], [0], [0], [1], [0, 0, 1, 1], [], []>} : vector<4x32xf32>, vector<32x4xf32>, vector<4x4xf32> -> vector<4x4xf32>
    %cst_55 = arith.constant 0.00999999977 : f32
    %49 = vector.broadcast %cst_55 : f32 to vector<4x4xf32>
    %50 = arith.mulf %48, %49 : vector<4x4xf32>
    %51 = arith.subf %38, %50 : vector<4x4xf32>
    %52 = math.absf %51 : vector<4x4xf32>
    %53 = vector.shape_cast %52 : vector<4x4xf32> to vector<1x4x4xf32>
    %cst_56 = arith.constant dense<0.000000e+00> : vector<1xf32>
    %54 = vector.multi_reduction <add>, %53, %cst_56 [1, 2] : vector<1x4x4xf32> to vector<1xf32>
    %55 = vector.shape_cast %54 : vector<1xf32> to vector<1x1x1xf32>
    %56 = vector.extract %55[0, 0, 0] : f32 from vector<1x1x1xf32>
    %57 = vector.broadcast %56 : f32 to vector<1x1xf32>
    %c0_57 = arith.constant 0 : index
    %c0_58 = arith.constant 0 : index
    %c0_59 = arith.constant 0 : index
    %58 = vector.load %arg10[%c0_57, %c0_58, %c0_59] : memref<1x1x1xf32, #tpu.memory_space<vmem>>, vector<1x1x1xf32>
    %59 = vector.shape_cast %58 : vector<1x1x1xf32> to vector<1x1xf32>
    %60 = vector.shape_cast %57 : vector<1x1xf32> to vector<1x1x1xf32>
    tpu.vector_store %arg10[%c0_57, %c0_58, %c0_59], %60 {strides = array<i32>} : memref<1x1x1xf32, #tpu.memory_space<vmem>>, vector<1x1x1xf32>,
    return
  }
  func.func @transform_0(%arg0: i32) -> (i32, i32, i32) {
    %c0_i32 = arith.constant 0 : i32
    %c0_i32_0 = arith.constant 0 : i32
    %c0_i32_1 = arith.constant 0 : i32
    %c0_i32_2 = arith.constant 0 : i32
    return %c0_i32, %c0_i32_0, %c0_i32_1 : i32, i32, i32
  }
  func.func @transform_1(%arg0: i32) -> (i32, i32) {
    %c0_i32 = arith.constant 0 : i32
    %c0_i32_0 = arith.constant 0 : i32
    %c0_i32_1 = arith.constant 0 : i32
    return %c0_i32, %c0_i32_0 : i32, i32
  }
  func.func @transform_2(%arg0: i32) -> (i32, i32) {
    %c0_i32 = arith.constant 0 : i32
    %c0_i32_0 = arith.constant 0 : i32
    %c0_i32_1 = arith.constant 0 : i32
    return %c0_i32, %c0_i32_0 : i32, i32
  }
  func.func @transform_3(%arg0: i32) -> (i32, i32) {
    %c0_i32 = arith.constant 0 : i32
    %c0_i32_0 = arith.constant 0 : i32
    %c0_i32_1 = arith.constant 0 : i32
    return %c0_i32, %c0_i32_0 : i32, i32
  }
  func.func @transform_4(%arg0: i32) -> (i32, i32) {
    %c0_i32 = arith.constant 0 : i32
    %c0_i32_0 = arith.constant 0 : i32
    %c0_i32_1 = arith.constant 0 : i32
    return %c0_i32, %c0_i32_0 : i32, i32
  }
  func.func @transform_5(%arg0: i32) -> (i32, i32) {
    %c0_i32 = arith.constant 0 : i32
    %c0_i32_0 = arith.constant 0 : i32
    %c0_i32_1 = arith.constant 0 : i32
    return %c0_i32, %c0_i32_0 : i32, i32
  }
  func.func @transform_6(%arg0: i32) -> (i32, i32, i32, i32) {
    %c0_i32 = arith.constant 0 : i32
    %c0_i32_0 = arith.constant 0 : i32
    %c0_i32_1 = arith.constant 0 : i32
    %c0_i32_2 = arith.constant 0 : i32
    return %arg0, %c0_i32, %c0_i32_0, %c0_i32_1 : i32, i32, i32, i32
  }
  func.func @transform_7(%arg0: i32) -> (i32, i32, i32) {
    %c0_i32 = arith.constant 0 : i32
    %c0_i32_0 = arith.constant 0 : i32
    %c0_i32_1 = arith.constant 0 : i32
    return %arg0, %c0_i32, %c0_i32_0 : i32, i32, i32
  }
  func.func @transform_8(%arg0: i32) -> (i32, i32, i32) {
    %c0_i32 = arith.constant 0 : i32
    %c0_i32_0 = arith.constant 0 : i32
    %c0_i32_1 = arith.constant 0 : i32
    return %arg0, %c0_i32, %c0_i32_0 : i32, i32, i32
  }
  func.func @transform_9(%arg0: i32) -> (i32, i32, i32) {
    %c0_i32 = arith.constant 0 : i32
    %c0_i32_0 = arith.constant 0 : i32
    %c0_i32_1 = arith.constant 0 : i32
    return %arg0, %c0_i32, %c0_i32_0 : i32, i32, i32
  }
}

</mosaic_0001>

<bundles_post_ra>
// kernel: tpu_custom_call.1
= control target key start
LH: loop header
LB: loop body
LE: loop exit
PB: predicated region body
PF: predicated region fallthrough
CT: control target
= control target key end

     0   :  { %s1443_s0 = inlined_call_operand.vmem [shape: f32[3,8,8], index: 0, kind: input, shape index: {}]   ;;  %s1444_s1 = inlined_call_operand.<no memory space> [shape: f32[1,1], index: 1, kind: input, shape index: {}]   ;;  %s1445_s2 = inlined_call_operand.vmem [shape: f32[32,8], index: 2, kind: input, shape index: {}]   ;;  %s1446_s3 = inlined_call_operand.vmem [shape: f32[8,32], index: 3, kind: input, shape index: {}]   ;;  %s1447_s4 = inlined_call_operand.vmem [shape: f32[4,32], index: 4, kind: input, shape index: {}]   ;;  %s1448_s5 = inlined_call_operand.vmem [shape: f32[32,4], index: 5, kind: input, shape index: {}]   ;;  %s1449_s6 = inlined_call_operand.hbm [shape: bf16[2,3,32,32], index: 6, kind: input, shape index: {}]   ;;  %s1450_s7 = inlined_call_operand.vmem [shape: bf16[2,32,32], index: 7, kind: input, shape index: {}]   ;;  %s1451_s8 = inlined_call_operand.hbm [shape: f32[2,4,4], index: 8, kind: output, shape index: {0}]   ;;  %s1452_s9 = inlined_call_operand.vmem [shape: f32[2,1,1], index: 9, kind: output, shape index: {1}]  }
   0x1   :  { %v15_v0 = vstv %s1444_s1 }
   0x2   :  { %16 = vst [vmem:[#allocation2] sm:$0x1] %v15_v0 }
   0x3   :  { %17 = vsyncpa [#allocation4], 0 }
   0x4   :  { %19 = vsyncpa [#allocation4 + $0x1], 0 }
   0x5   :  { %20 = vsyncpa [#allocation5], 0 }
   0x6   :  { %22 = vsyncpa [#allocation5 + $0x1], 0  ;;  %s1223_s11 = smov 0   ;;  %s1225_s12 = smov 0  }
   0x7   :  { %s1227_s13 = smov 0   ;;  %s1229_s14 = smov 0  }
   0x8 LB: > { %1456 = sst [smem:[#allocation9_spill]] %s1161_s13  ;;  %s1244_s1 = sadd.s32 4294967295, %s1165_s14   ;;  %s1165_s14 = sphi %s1229_s14, %s1463_s14   ;;  %s1161_s13 = sphi %s1227_s13, %s1465_s13   ;;  %s1157_s12 = sphi %s1225_s12, %s1467_s12   ;;  %s1153_s11 = sphi %s1223_s11, %s1466_s11  }
   0x9   : > { %s922_s15 = sadd.s32 4294967294, %s1165_s14   ;;  %s1248_s16 = sadd.s32 1, %s1165_s14  }
   0xa   : > { %1457 = sst [smem:[#allocation10_spill]] %s1248_s16  ;;  %s161_s17 = sadd.s32 1, %s1161_s13 }
   0xb   : > { %s158_s18 = ssub.s32 %s1165_s14, %s1248_s16  ;;  %p168_p0 = scmp.ne.s32.totalorder %s1161_s13, %s1157_s12 }
   0xc   : > { %p159_p1 = scmp.eq.s32.totalorder %s158_s18, 0  ;;  %p169_p2 = scmp.eq.s32.totalorder %s1165_s14, 0 }
   0xd   : > { %p174_p3 = scmp.ne.s32.totalorder %s1157_s12, %s1153_s11  ;;  %p175_p4 = scmp.eq.s32.totalorder %s1244_s1, 0 }
   0xe   : > { %s1260_s19 = scalar_select %p159_p1, %s1161_s13, %s161_s17  }
   0xf   : > { %p170_p5 = por %p169_p2, %p168_p0  ;;  %p1262_p6 = por %p175_p4, %p174_p3 }
  0x10   : > { %1458 = sst [smem:[#allocation11_spill]] %s1260_s19  ;;  %p224_p7 = scmp.eq.s32.totalorder %s1244_s1, 1 }
  0x11   : > { %p230_p8 = scmp.eq.s32.totalorder %s922_s15, 1  ;;  %p924_p9 = scmp.ge.s32.totalorder %s1165_s14, 2 }
  0x12   : > { %p1030_p10 = scmp.lt.s32.totalorder %s1165_s14, 2  ;;  %p1269_p11 = por %p224_p7, %p168_p0 }
  0x13   : > { %p1273_p12 = por %p230_p8, %p174_p3  ;;  %s294_s23 = sand.u32 1, %s1161_s13  }
  0x14   : > { %s1014_s24 = smul.u32 48, %s1165_s14  ;;  %p1282_p13 = pnand %p1030_p10, %p170_p5 }
  0x15   : > { %s1013_s25 = smul.u32 48, %s294_s23  ;;  %s295_s17 = scalar_lea.sflag [#allocation4], %s294_s23 }
  0x16   : > { %s303_s28 = scalar_lea.hbm %s1449_s6, %s1014_s24  ;;  %p1073_p1 = pneg %p1282_p13 }
  0x17   : > { %s304_s30 = sshll.u32 %s303_s28, 4  ;;  %s298_s10 = scalar_lea.vmem [#allocation3], %s1013_s25  ;;  %s305_s30 = int_to_ptr.hbm [resolvable:$true] %s304_s30 }
  0x18   : > { %s306_s15 = sshll.u32 %s298_s10, 4  ;;  %s1069_s18 = sshra.s32 %s305_s30, 4  ;;  %s307_s15 = int_to_ptr.vmem [resolvable:$true] %s306_s15  ;;  %s1070_s18 = int_to_ptr.hbm [resolvable:$true] %s1069_s18 }
  0x19   : > { %s1071_s19 = scalar_lea.hbm %s1070_s18, 48  ;;  %s1076_s27 = scalar_lea.hbm %s1449_s6, 96 }
  0x1a   : > { %p1072_p0 = scmp.ne.s32.totalorder %s1070_s18, %s1071_s19  ;;  %p1077_p4 = scmp.lt.s32.totalorder %s1070_s18, %s1449_s6 }
  0x1b   : > { %p1078_p5 = scmp.lt.s32.totalorder %s1076_s27, %s1071_s19 }
  0x1c   : > { %p1074_p2 = pnand %p1073_p1, %p1072_p0 }
  0x1d   : > { %p1079_p7 = por %p1078_p5, %p1077_p4 }
  0x1e   : > { %p1075_p3 = pneg %p1074_p2 }
  0x20   : > { %p1080_p8 = pnand %p1079_p7, %p1075_p3 }
  0x22   : > { %1083 = shalt.err (!%p1080_p8)
}
  0x23   : > { %s1167_s23 = smov 64   ;;  %s1168_s25 = smov 4  }
  0x24   : > { %1025 = dma.hbm_to_vmem [thread:$0]  (!%p1282_p13), %s305_s30, 768, %s307_s15, %s295_s17, %s1167_s23, %s1167_s23, %s1168_s25  }
  0x25   : > { %p926_p10 = scmp.ge.s32.totalorder %s1165_s14, 1  ;;  %p322_p0 = scmp.lt.s32.totalorder %s1165_s14, 3 }
  0x27   : > { %p323_p1 = pnand %p926_p10, %p322_p0 }
  0x28   : > { %s1299_s28 = sand.u32 (!%p323_p1), 1, %s1157_s12  }
  0x29   : > { %326 = sbr.rel (%p323_p1) target bundleno = 819 (0x333), region = 52  ;;  %s329_s16 = scalar_lea.sflag (!%p323_p1), [#allocation4], %s1299_s28 }
  0x2a   : > { %s1015_s13 = smul.u32 (!%p323_p1), 48, %s1299_s28 }
  0x2c   : > { %s1303_s19 = scalar_lea.vmem (!%p323_p1), [#allocation3], %s1015_s13 }
  0x2e   : > { %1144 = dma.done.wait (%p1262_p6), %s329_s16, 768  }
  0x2f   : > { %1146 = vsyncadd (%p1262_p6), %s329_s16, 4294966528  ;;  %vm397_vm0 = vcmask 64512   ;;  %v396_v1 = vld [vmem:[%s1443_s0] sm:$0xff]  ;;  %v395_v3 = vld [vmem:[%s1445_s2 + $0x18] sm:$0xff]  ;;  %p376_p6 = scmp.lt.s32.totalorder %s1244_s1, 1  ;;  %vm664_vm1 = vcmask 261120  }
  0x30   : > { %v392_v2 = vld [vmem:[%s1445_s2] sm:$0xff]  ;;  %425 = vmatpush.msra.mxu0 %v396_v1  ;;  %1011 = vmatpush.msra.mxu2 %v396_v1  ;;  %v942_v4 = vld [vmem:[%s1443_s0 + $0x8] sm:$0xff]  ;;  %v955_v5 = vld [vmem:[%s1443_s0 + $0x10] sm:$0xff]  ;;  %s927_s17 = sshll.u32 %s1299_s28, 2  ;;  %vm722_vm2 = vcmask 27648   ;;  %s969_s24 = sshll.u32 %s1244_s1, 2 }
  0x31   : > { %930 = vmatmul.msk.f32.vlgmr.msra.gmra.mxu0 %vm397_vm0, %v392_v2  ;;  %933 = vmatmul.msk.f32.vlgmr.msra.gmra.mxu2 %vm397_vm0, %v395_v3  ;;  %v393_v6 = vld [vmem:[%s1445_s2 + $0x8] sm:$0xff]  ;;  %v394_v7 = vld [vmem:[%s1445_s2 + $0x10] sm:$0xff]  ;;  %v439_v8 = vld [vmem:[%s1446_s3] sm:$0xff]  ;;  %s1381_s20 = scalar_select %p376_p6, %s1244_s1, 1 }
  0x32   : > { %511 = vmatpush.msrb.mxu2 %v942_v4  ;;  %600 = vmatpush.msrb.mxu0 %v955_v5  ;;  %v1360_v30 = vld [vmem:[%s1448_s5 + $0x18] sm:$0xff]  ;;  %v1365_v31 = vld [vmem:[%s1448_s5 + $0x10] sm:$0xff]  ;;  %v1371_v32 = vld [vmem:[%s1448_s5 + $0x8] sm:$0xff]  ;;  %s370_s18 = scalar_lea.vmem [#allocation6], %s927_s17  ;;  %s800_s13 = scalar_lea.sflag [#allocation5], %s1299_s28 }
  0x33   : > { %467 = vmatpush.msra.mxu1 %v439_v8  ;;  %1012 = vmatpush.msra.mxu3 %v439_v8  ;;  %v1005_v33 = vld [vmem:[%s1303_s19 + $0x8] sm:$0xff]   ;;  %v1007_v34 = vld [vmem:[%s1303_s19 + $0x18] sm:$0xff]   ;;  %v1006_v41 = vld [vmem:[%s1303_s19 + $0x10] sm:$0xff]   ;;  %s972_s27 = sshll.u32 %s1381_s20, 4  ;;  %s815_s23 = sshll.u32 %s370_s18, 4  ;;  %s816_s23 = int_to_ptr.vmem [resolvable:$true] %s815_s23 }
  0x34   : > { %v988_v36 = vunpack.c.h.bf16 %v1007_v34  ;;  %v1009_v37 = vld [vmem:[%s1303_s19 + $0x28] sm:$0xff]   ;;  %v980_v38 = vunpack.c.h.bf16 %v1005_v33  ;;  %v987_v39 = vunpack.c.l.bf16 %v1007_v34  ;;  %v979_v40 = vunpack.c.l.bf16 %v1005_v33  ;;  %v974_v43 = vld [vmem:[%s1303_s19] sm:$0xff]   ;;  %s380_s25 = scalar_lea.vmem %s1450_s7, %s972_s27  ;;  %s1119_s1 = scalar_lea.hbm %s1451_s8, 8 }
  0x35   : > { %552 = vmatpush.msrb.mxu3 %v439_v8  ;;  %641 = vmatpush.msrb.mxu1 %v439_v8  ;;  %v1008_v44 = vld [vmem:[%s1303_s19 + $0x20] sm:$0xff]   ;;  %v984_v45 = vunpack.c.h.bf16 %v1006_v41  ;;  %v995_v46 = vunpack.c.l.bf16 %v1009_v37  ;;  %v996_v48 = vunpack.c.h.bf16 %v1009_v37  ;;  %v976_v49 = vunpack.c.h.bf16 %v974_v43  ;;  %s813_s19 = scalar_lea.hbm %s1451_s8, %s969_s24 }
  0x36   : > { %v983_v51 = vunpack.c.l.bf16 %v1006_v41  ;;  %v992_v52 = vunpack.c.h.bf16 %v1008_v44  ;;  %v975_v54 = vunpack.c.l.bf16 %v974_v43  ;;  %v991_v56 = vunpack.c.l.bf16 %v1008_v44 }
  0x39   : > { %931 = vmatmul.msk.f32.gmra.mxu0 %vm397_vm0, %v393_v6  ;;  %943 = vmatmul.msk.f32.vlgmr.msrb.gmra.mxu2 %vm397_vm0, %v392_v2 }
  0x41   : > { %932 = vmatmul.msk.f32.gmra.mxu0 %vm397_vm0, %v394_v7  ;;  %944 = vmatmul.msk.f32.gmra.mxu2 %vm397_vm0, %v393_v6 }
  0x49   : > { %945 = vmatmul.msk.f32.gmra.mxu2 %vm397_vm0, %v394_v7  ;;  %956 = vmatmul.msk.f32.vlgmr.msrb.gmra.mxu0 %vm397_vm0, %v392_v2 }
  0x51   : > { %946 = vmatmul.msk.f32.gmra.mxu2 %vm397_vm0, %v395_v3  ;;  %957 = vmatmul.msk.f32.gmra.mxu0 %vm397_vm0, %v393_v6 }
  0x59   : > { %958 = vmatmul.msk.f32.gmra.mxu0 %vm397_vm0, %v394_v7  ;;  %v1010_v7 = vld [vmem:[%s380_s25 + $0x8] sm:$0xff]  }
  0x61   : > { %959 = vmatmul.msk.f32.gmra.mxu0 %vm397_vm0, %v395_v3 }
  0xae   : > { %v427_v9 = vpop.f32.mrf.mxu0 }
  0xaf   : > { %934 = vmatmul.msk.f32.vlgmr.msra.gmra.mxu1 %vm397_vm0, %v427_v9 }
  0xb4   : > { %v436_v10 = vpop.f32.mrf.mxu2 }
  0xb5   : > { %937 = vmatmul.msk.f32.vlgmr.msra.gmra.mxu3 %vm397_vm0, %v436_v10 }
  0xb6   : > { %v430_v11 = vpop.f32.mrf.mxu0  ;;  %714 = vmatpush.msra.mxu3 %v1360_v30 }
  0xb7   : > { %935 = vmatmul.msk.f32.gmra.mxu1 %vm397_vm0, %v430_v11  ;;  %v663_v11 = vld [vmem:[%s1447_s4] sm:$0xf] }
  0xb8   : > { %715 = vmatpush.msra.mxu3 %v1365_v31 }
  0xba   : > { %716 = vmatpush.msra.mxu3 %v1371_v32 }
  0xbc   : > { %v513_v12 = vpop.f32.mrf.mxu2 }
  0xbd   : > { %947 = vmatmul.msk.f32.vlgmr.msrb.gmra.mxu3 %vm397_vm0, %v513_v12  ;;  %v1004_v12 = vunpack.c.h.bf16 %v1010_v7 }
  0xbe   : > { %v433_v13 = vpop.f32.mrf.mxu0 }
  0xbf   : > { %936 = vmatmul.msk.f32.gmra.mxu1 %vm397_vm0, %v433_v13  ;;  %v998_v13 = vld [vmem:[%s380_s25] sm:$0xff]   ;;  %s817_s25 = sshll.u32 %s813_s19, 4  ;;  %s818_s25 = int_to_ptr.hbm [resolvable:$true] %s817_s25 }
  0xc0   : > { %s1113_s16 = sshra.s32 %s818_s25, 4  ;;  %s1114_s16 = int_to_ptr.hbm [resolvable:$true] %s1113_s16 }
  0xc1   : > { %s1115_s29 = scalar_lea.hbm %s1114_s16, 4  ;;  %p1120_p4 = scmp.lt.s32.totalorder %s1114_s16, %s1451_s8 }
  0xc2   : > { %p1116_p13 = scmp.ne.s32.totalorder %s1114_s16, %s1115_s29  ;;  %p1121_p5 = scmp.lt.s32.totalorder %s1119_s1, %s1115_s29 }
  0xc4   : > { %v516_v14 = vpop.f32.mrf.mxu2  ;;  %p1117_p2 = pnand %p1116_p13, %p1269_p11  ;;  %p1122_p7 = por %p1121_p5, %p1120_p4 }
  0xc5   : > { %948 = vmatmul.msk.f32.gmra.mxu3 %vm397_vm0, %v516_v14  ;;  %v1003_v14 = vunpack.c.l.bf16 %v1010_v7 }
  0xc6   : > { %v602_v15 = vpop.f32.mrf.mxu0  ;;  %p1118_p3 = pneg %p1117_p2 }
  0xc7   : > { %960 = vmatmul.msk.f32.vlgmr.msrb.gmra.mxu1 %vm397_vm0, %v602_v15  ;;  %v1000_v15 = vunpack.c.h.bf16 %v998_v13 }
  0xc8   : > { %p1123_p8 = pnand %p1122_p7, %p1118_p3 }
  0xcc   : > { %v519_v16 = vpop.f32.mrf.mxu2 }
  0xcd   : > { %949 = vmatmul.msk.f32.gmra.mxu3 %vm397_vm0, %v519_v16  ;;  %v999_v16 = vunpack.c.l.bf16 %v998_v13 }
  0xce   : > { %v605_v17 = vpop.f32.mrf.mxu0 }
  0xcf   : > { %961 = vmatmul.msk.f32.gmra.mxu1 %vm397_vm0, %v605_v17  ;;  %v732_v17 = vld [vmem:[%s1447_s4] sm:$0xf] }
  0xd4   : > { %v522_v18 = vpop.f32.mrf.mxu2 }
  0xd5   : > { %950 = vmatmul.msk.f32.gmra.mxu3 %vm397_vm0, %v522_v18  ;;  %v688_v18 = vld [vmem:[%s1448_s5] sm:$0xff] }
  0xd6   : > { %v608_v19 = vpop.f32.mrf.mxu0  ;;  %717 = vmatpush.msra.mxu3 %v688_v18 }
  0xd7   : > { %962 = vmatmul.msk.f32.gmra.mxu1 %vm397_vm0, %v608_v19  ;;  %v1068_v19 = vld [vmem:[#allocation2] ss:$0 sm:$0xff] }
  0xd8   : > { %775 = vmatpush.msrb.mxu3 %v1360_v30 }
  0xda   : > { %776 = vmatpush.msrb.mxu3 %v1365_v31 }
  0xdc   : > { %777 = vmatpush.msrb.mxu3 %v1371_v32 }
  0xde   : > { %v611_v20 = vpop.f32.mrf.mxu0  ;;  %778 = vmatpush.msrb.mxu3 %v688_v18 }
  0xdf   : > { %963 = vmatmul.msk.f32.gmra.mxu1 %vm397_vm0, %v611_v20  ;;  %v1169_v20 = vmov 0  }
  0xe0   : > { %1067 = vset.pattern.permute.xlu0 %v1169_v20 }
  0xe1   : > { %696 = vperm.xlu0 %1067, %v1068_v19  }
 0x12c   : > { %v469_v21 = vpop.f32.mrf.mxu1 }
 0x12d   : > { %v481_v3 = vmul.f32 %v975_v54, %v469_v21 }
 0x134   : > { %v472_v22 = vpop.f32.mrf.mxu1 }
 0x135   : > { %v482_v62 = vmul.f32 %v976_v49, %v472_v22 }
 0x138   : > { %v478_v23 = vpop.f32.mrf.mxu3 }
 0x139   : > { %v484_v50 = vmul.f32 %v980_v38, %v478_v23 }
 0x13c   : > { %v475_v24 = vpop.f32.mrf.mxu1 }
 0x13d   : > { %v483_v55 = vmul.f32 %v979_v40, %v475_v24 }
 0x140   : > { %v554_v25 = vpop.f32.mrf.mxu3 }
 0x141   : > { %v566_v63 = vmul.f32 %v983_v51, %v554_v25 }
 0x143   : > { %v570_v8 = vadd.f32 %v566_v63, %v481_v3 }
 0x144   : > { %v643_v26 = vpop.f32.mrf.mxu1 }
 0x145   : > { %v655_v4 = vmul.f32 %v991_v56, %v643_v26 }
 0x147   : > { %v659_v10 = vadd.f32 %v655_v4, %v570_v8 }
 0x148   : > { %v557_v27 = vpop.f32.mrf.mxu3 }
 0x149   : > { %v567_v58 = vmul.f32 %v984_v45, %v557_v27 }
 0x14b   : > { %v571_v5 = vadd.f32 %v567_v58, %v482_v62 }
 0x14c   : > { %v646_v28 = vpop.f32.mrf.mxu1 }
 0x14d   : > { %v656_v0 = vmul.f32 %v992_v52, %v646_v28 }
 0x14f   : > { %v660_v9 = vadd.f32 %v656_v0, %v571_v5 }
 0x150   : > { %v560_v29 = vpop.f32.mrf.mxu3 }
 0x151   : > { %v568_v53 = vmul.f32 %v987_v39, %v560_v29 }
 0x153   : > { %v572_v1 = vadd.f32 %v568_v53, %v483_v55  ;;  %v697_v23 = vpop.permute.xlu0 %696 }
 0x154   : > { %v649_v35 = vpop.f32.mrf.mxu1 }
 0x155   : > { %v657_v59 = vmul.f32 %v995_v46, %v649_v35 }
 0x157   : > { %v661_v6 = vadd.f32 %v657_v59, %v572_v1 }
 0x158   : > { %v563_v42 = vpop.f32.mrf.mxu3 }
 0x159   : > { %v569_v47 = vmul.f32 %v988_v36, %v563_v42 }
 0x15b   : > { %v573_v60 = vadd.f32 %v569_v47, %v484_v50 }
 0x15c   : > { %v652_v57 = vpop.f32.mrf.mxu1 }
 0x15d   : > { %v658_v61 = vmul.f32 %v996_v48, %v652_v57 }
 0x15f   : > { %v662_v2 = vadd.f32 %v658_v61, %v573_v60 }
 0x161   : > { %680 = vmatpush.msra.mxu2 %v662_v2 }
 0x163   : > { %681 = vmatpush.msra.mxu2 %v661_v6 }
 0x165   : > { %682 = vmatpush.msra.mxu2 %v660_v9 }
 0x167   : > { %683 = vmatpush.msra.mxu2 %v659_v10 }
 0x168   : > { %964 = vmatmul.msk.f32.vlgmr.msra.gmra.mxu2 %vm664_vm1, %v663_v11 }
 0x169   : > { %748 = vmatpush.msrb.mxu2 %v1004_v12 }
 0x16b   : > { %749 = vmatpush.msrb.mxu2 %v1003_v14 }
 0x16d   : > { %750 = vmatpush.msrb.mxu2 %v1000_v15 }
 0x16f   : > { %751 = vmatpush.msrb.mxu2 %v999_v16 }
 0x170   : > { %966 = vmatmul.msk.f32.vlgmr.msrb.gmra.mxu2 %vm664_vm1, %v732_v17 }
 0x1eb   : > { %v685_v21 = vpop.f32.mrf.mxu2 }
 0x1ec   : > { %965 = vmatmul.msk.f32.vlgmr.msra.gmra.mxu3 %vm664_vm1, %v685_v21 }
 0x1f3   : > { %v753_v22 = vpop.f32.mrf.mxu2 }
 0x1f4   : > { %967 = vmatmul.msk.f32.vlgmr.msrb.gmra.mxu3 %vm664_vm1, %v753_v22 }
 0x26f   : > { %v719_v24 = vpop.f32.mrf.mxu3 }
 0x270   : > { %v720_v25 = vadd.f32 %v719_v24, %v697_v23 }
 0x272   : > { %723 = vst.msk [vmem:[%s370_s18] sm:$0xf] %vm722_vm2, %v720_v25 }
 0x277   : > { %v780_v26 = vpop.f32.mrf.mxu3 }
 0x278   : > { %v783_v27 = vmul.f32 0.01, %v780_v26 }
 0x27a   : > { %v784_v28 = vsub.f32 %v720_v25, %v783_v27 }
 0x27c   : > { %v785_v29 = vand.u32 2147483647, %v784_v28 }
 0x27e   : > { %v786_v30 = vsel %vm722_vm2, %v785_v29, 0.0 }
 0x27f   : > { %787 = vadd.xlane.f32.xlu0 %v786_v30 }
 0x280   : > { %1126 = shalt.err (!%p1123_p8)
}
 0x281   : > { %1020 = dma.vmem_to_hbm [thread:$0]  (%p1269_p11), %s816_s23, 64, %s818_s25, %s800_s13   ;;  %vm797_vm3 = vcmask 0  }
 0x282   : > { %s383_s24 = scalar_lea.vmem %s1452_s9, %s1381_s20 }
 0x2f2   : > { %v788_v31 = vpop.xlane.xlu0 %787 }
 0x2f3   : > { %v789_v32 = vrot.slane %v788_v31, 4 }
 0x2f5   : > { %v790_v33 = vadd.f32 %v789_v32, %v788_v31 }
 0x2f7   : > { %v791_v34 = vrot.slane %v790_v33, 2 }
 0x2f9   : > { %v792_v35 = vadd.f32 %v791_v34, %v790_v33 }
 0x2fb   : > { %v793_v36 = vrot.slane %v792_v35, 1 }
 0x2fd   : > { %v794_v37 = vadd.f32 %v793_v36, %v792_v35 }
 0x2ff   : > { %1016 = vpush %v794_v37 }
 0x330   : > { %s1017_s26 = spop %1016 }
 0x331   : > { %v796_v38 = vstv %s1017_s26 }
 0x332   : > { %798 = vst.msk [vmem:[%s383_s24] sm:$0x1] %vm797_vm3, %v796_v38 }
 0x333 PF: > { %s832_s21 = sand.u32 1, %s1153_s11   ;;  %p1027_p11 = pnand %p924_p9, %p1273_p12 }
 0x334   : > { %s833_s27 = scalar_lea.sflag [#allocation5], %s832_s21 }
 0x335   : > { %p1028_p10 = pneg %p1027_p11 }
 0x337   : > { %1148 = dma.done.wait (%p1028_p10), %s833_s27, 64  }
 0x338   : > { %1150 = vsyncadd (%p1028_p10), %s833_s27, 4294967232  ;;  %s1463_s14 = sld [smem:[#allocation10_spill]]  ;;  %s1466_s11 = smov %s1157_s12 }
 0x339   : > { %s1464_s19 = sld [smem:[#allocation9_spill]] }
 0x33a   : > { %s1465_s13 = sld [smem:[#allocation11_spill]] }
 0x33e   : > { %p25_p0 = scmp.ge.s32.totalorder %s1463_s14, 4  }
 0x33f   : > { %s1467_s12 = smov %s1464_s19 }
 0x340   :  { %27 = sbr.rel (!%p25_p0) target bundleno = 8 (0x8), region = 116 }
 0x345   :  { %845 = vsyncpa [#allocation4], 1 }
 0x346   :  { %847 = vsyncpa [#allocation4 + $0x1], 1 }
 0x347   :  { %848 = vsyncpa [#allocation5], 1 }
 0x348   :  { %850 = vsyncpa [#allocation5 + $0x1], 1 }

</bundles_post_ra>
